<compile_context>
chip_gen: v6e
topology: v6e:2x2x1
jax: 0.10.0
libtpu: 0.0.40
codegen_flags: <defaults>
</compile_context>

<pallas_src>
import functools

import jax
import jax.numpy as jnp
from jax.experimental import pallas as pl
from jax.experimental.pallas import tpu as pltpu


_CHUNK_THRESHOLD_BYTES = 4 * 1024 * 1024   # below this, one DMA is plenty
_MAX_CHUNKS = 4                            # a handful of in-flight DMAs saturates HBM


def _dma_copy_kernel(x_ref, o_ref, sems, *, chunk_bounds):
    """Pure HBM->HBM copy: no VMEM staging, no grid, no masked stores."""
    if chunk_bounds is None:
        # Whole-array copy with a single DMA (also covers 0-d / small inputs).
        cp = pltpu.make_async_copy(x_ref, o_ref, sems.at[0])
        cp.start()
        cp.wait()
        return
    copies = []
    for i, (start, size) in enumerate(chunk_bounds):
        cp = pltpu.make_async_copy(
            x_ref.at[pl.ds(start, size)],
            o_ref.at[pl.ds(start, size)],
            sems.at[i],
        )
        cp.start()          # issue every DMA first so they overlap
        copies.append(cp)
    for cp in copies:
        cp.wait()


@jax.jit
def _identity_copy_pallas(x: jax.Array) -> jax.Array:
    """Bit-exact copy of `x` through a Pallas TPU kernel (pure-DMA path)."""
    if x.size == 0:
        return x

    nbytes = x.size * jnp.dtype(x.dtype).itemsize
    # Static (trace-time) chunking decision along the leading dim.
    if x.ndim >= 1 and x.shape[0] >= 2 and nbytes >= _CHUNK_THRESHOLD_BYTES:
        nchunks = min(_MAX_CHUNKS, x.shape[0])
        base, rem = divmod(x.shape[0], nchunks)
        bounds, start = [], 0
        for i in range(nchunks):
            size = base + (1 if i < rem else 0)
            bounds.append((start, size))
            start += size
    else:
        nchunks = 1
        bounds = None

    return pl.pallas_call(
        functools.partial(_dma_copy_kernel, chunk_bounds=bounds),
        out_shape=jax.ShapeDtypeStruct(x.shape, x.dtype),
        in_specs=[pl.BlockSpec(memory_space=pl.ANY)],
        out_specs=pl.BlockSpec(memory_space=pl.ANY),
        scratch_shapes=[pltpu.SemaphoreType.DMA((nchunks,))],
    )(x)


def mlp_identity(x: jax.Array, iter_num=None) -> jax.Array:
    """Forward pass of MLP_Identity: returns x unchanged (zero-cost)."""
    return x


def mlp_identity_pallas(x: jax.Array, iter_num=None) -> jax.Array:
    """MLP_Identity forward routed through the explicit Pallas DMA-copy kernel."""
    return _identity_copy_pallas(x)


if __name__ == "__main__":
    key = jax.random.PRNGKey(0)
    # Small shapes consistent with a transformer MLP input: (batch, seq, hidden)
    B, T, C = 2, 8, 32
    x = jax.random.normal(key, (B, T, C), dtype=jnp.float32)

    y_fast = mlp_identity(x, iter_num=0)          # production path: true identity
    y_kern = mlp_identity_pallas(x, iter_num=0)   # explicit Pallas kernel path
    jax.block_until_ready((y_fast, y_kern))

    assert y_fast.shape == x.shape and y_fast.dtype == x.dtype
    assert y_kern.shape == x.shape and y_kern.dtype == x.dtype
    assert jnp.array_equal(y_fast, x)
    assert jnp.array_equal(y_kern, x)
    print("KERNEL_OK")
</pallas_src>

<mosaic_0001>
module attributes {stable_mosaic.version = 11 : i64} {
  func.func @_dma_copy_kernel(%arg0: memref<2x8x32xf32, #tpu.memory_space<any>>, %arg1: memref<2x8x32xf32, #tpu.memory_space<any>>, %arg2: memref<1x!tpu.dma_semaphore, #tpu.memory_space<semaphore_mem>>) attributes {dimension_semantics = [], scalar_prefetch = 0 : i64, scratch_operands = 1 : i64, tpu.core_type = #tpu.core_type<tc>} {
    %c0_i32 = arith.constant 0 : i32
    %0 = tpu.memref_slice %arg2[%c0_i32] : memref<1x!tpu.dma_semaphore, #tpu.memory_space<semaphore_mem>> -> memref<1x!tpu.dma_semaphore, #tpu.memory_space<semaphore_mem>>
    %1 = tpu.memref_squeeze %0 : memref<1x!tpu.dma_semaphore, #tpu.memory_space<semaphore_mem>> -> memref<!tpu.dma_semaphore, #tpu.memory_space<semaphore_mem>>
    tpu.enqueue_dma source(%arg0 : memref<2x8x32xf32, #tpu.memory_space<any>>) target(%arg1 : memref<2x8x32xf32, #tpu.memory_space<any>>) target_semaphore(%1 : memref<!tpu.dma_semaphore, #tpu.memory_space<semaphore_mem>>)
    %c0_i32_0 = arith.constant 0 : i32
    %2 = tpu.memref_slice %arg2[%c0_i32_0] : memref<1x!tpu.dma_semaphore, #tpu.memory_space<semaphore_mem>> -> memref<1x!tpu.dma_semaphore, #tpu.memory_space<semaphore_mem>>
    %3 = tpu.memref_squeeze %2 : memref<1x!tpu.dma_semaphore, #tpu.memory_space<semaphore_mem>> -> memref<!tpu.dma_semaphore, #tpu.memory_space<semaphore_mem>>
    tpu.wait_dma2 semaphore(%3 : memref<!tpu.dma_semaphore, #tpu.memory_space<semaphore_mem>>) src(%arg0 : memref<2x8x32xf32, #tpu.memory_space<any>>) dst(%arg1 : memref<2x8x32xf32, #tpu.memory_space<any>>)
    return
  }
}

</mosaic_0001>

<bundles_post_ra>
// kernel: _identity_copy_pallas.1
= control target key start
LH: loop header
LB: loop body
LE: loop exit
PB: predicated region body
PF: predicated region fallthrough
CT: control target
= control target key end

     0   :  { %s29_s6 = smov [#allocation2]   ;;  %s30_s7 = smov 131072   ;;  %s48_s0 = inlined_call_operand.hbm [shape: f32[2,8,32], index: 0, kind: input, shape index: {}]   ;;  %s49_s1 = inlined_call_operand.hbm [shape: f32[2,8,32], index: 1, kind: output, shape index: {}]  }
   0x1   :  { %s31_s8 = smov 0  }
   0x2   :  { %12 = dma.general %s48_s0, 256, %s49_s1, %s29_s6, %s30_s7, [#allocation4], %s31_s8, 0  }
   0x3   :  { %27 = dma.done.wait [#allocation2], 256 }
   0x4   :  { %28 = vsyncadd [#allocation2], 4294967040 }
   0x5   :  { %17 = vsyncmov [#allocation2] }
   0x8   :  { %s18_s13 = vpop.sfrf %17 }
   0x9   :  { %p23_p0 = scmp.ne.s32.totalorder %s18_s13, 0 }
   0xb   :  { %22 = shalt.err (%p23_p0)  }

</bundles_post_ra>
